<compile_context>
chip_gen: v7x
topology: tpu7x:2x2x1
jax: 0.10.0
libtpu: 0.0.40
codegen_flags: <defaults>
</compile_context>

<pallas_src>
import jax
import jax.numpy as jnp
from jax.experimental import pallas as pl
from jax.experimental.pallas import tpu as pltpu

BN_EPS = 1e-5
_LANE = 128
_SUBLANE = 8
_TILE_CAP = 2048            # per review: 1024-2048 rows is the sweet spot for dp <= 512
_VMEM_BUDGET = 16 << 20     # conservative per-step budget; fits v7x scoped default


def _round_up(a, b):
    return (a + b - 1) // b * b


def _pick_tile_m(n_rows, k, d):
    """Row-tile size from a VMEM budget (double-buffered x + out blocks, f32,
    lane-padded to 128 lanes in VMEM)."""
    k_vmem = _round_up(max(k, 1), _LANE)
    d_vmem = _round_up(max(d, 1), _LANE)
    per_row_bytes = 2 * 4 * (k_vmem + d_vmem)      # 2 buffers each for x and out
    budget_rows = max(_SUBLANE, _VMEM_BUDGET // per_row_bytes)
    tile = min(_TILE_CAP, budget_rows, _round_up(n_rows, _SUBLANE))
    return max(_SUBLANE, (tile // _SUBLANE) * _SUBLANE)


def _linear_bn_apply_kernel(x_ref, w_ref, shift_ref, o_ref):
    """Single-phase fused Linear + BatchNorm1d apply.

    BN (training-mode batch statistics) is already folded into the weights and the
    per-column shift by the wrapper, so the body is one MXU matmul + one add.
    """
    o_ref[...] = (
        jnp.dot(x_ref[...], w_ref[...], preferred_element_type=jnp.float32)
        + shift_ref[...]
    )


def _encode_group(x, w, b, gamma, beta):
    """One encoder: BN(x @ W + b) with training-mode batch statistics."""
    n, k = x.shape
    d = w.shape[1]
    if n == 0:  # guard empty node/edge sets (static shape under jit)
        return jnp.zeros((0, d), jnp.float32)

    x = x.astype(jnp.float32)

    # ---- Fold BatchNorm into the Linear (tiny O(N*K^2 + K^2*D) XLA work) ----
    # mean(h) = mean(x) @ W + b ;  var(h_j) = w_j^T Cov(x) w_j  (bias drops out).
    # Cov(x) is computed two-pass (centered) for numerical stability.
    mean_x = jnp.mean(x, axis=0, keepdims=True)                  # [1, K]
    xc = x - mean_x
    cov_x = (xc.T @ xc) * (1.0 / n)                              # [K, K]
    var_h = jnp.maximum(jnp.einsum("kd,kl,ld->d", w, cov_x, w), 0.0)[None, :]
    mean_h = mean_x @ w + b                                      # [1, D]
    scale = gamma / jnp.sqrt(var_h + BN_EPS)                     # [1, D]
    w_scaled = w * scale                                         # [K, D]
    shift = beta + (b - mean_h) * scale                          # [1, D]

    # ---- Single-phase Pallas kernel over row tiles ----
    tile_m = _pick_tile_m(n, k, d)
    num_tiles = (n + tile_m - 1) // tile_m

    return pl.pallas_call(
        _linear_bn_apply_kernel,
        out_shape=jax.ShapeDtypeStruct((n, d), jnp.float32),
        grid=(num_tiles,),
        in_specs=[
            pl.BlockSpec((tile_m, k), lambda i: (i, 0)),   # x row tile
            pl.BlockSpec((k, d), lambda i: (0, 0)),        # BN-folded weights (resident)
            pl.BlockSpec((1, d), lambda i: (0, 0)),        # per-column shift (resident)
        ],
        out_specs=pl.BlockSpec((tile_m, d), lambda i: (i, 0)),
        compiler_params=pltpu.CompilerParams(
            # No cross-tile carry -> row-tile axis is fully parallel (2 TCs on v7x).
            dimension_semantics=("parallel",),
            vmem_limit_bytes=32 * 1024 * 1024,
        ),
    )(x, w_scaled, shift)


@jax.jit
def _feature_encoder_forward(params, x, edge_attr):
    """node_encoder -> node_encoder_bn ; edge_encoder -> edge_encoder_bn."""
    out_x = _encode_group(x, params["w_node"], params["b_node"],
                          params["gamma_node"], params["beta_node"])
    out_e = _encode_group(edge_attr, params["w_edge"], params["b_edge"],
                          params["gamma_edge"], params["beta_edge"])
    return out_x, out_e


class FeatureEncoderPallas:
    """JAX/Pallas port of FeatureEncoder.forward (node/edge Linear + BatchNorm1d)."""

    def __init__(self, dim_in_node, dim_in_edge, dim_inner, key):
        ks = jax.random.split(key, 8)
        init = lambda k, fan_in, shape: (jax.random.normal(k, shape, jnp.float32)
                                         / jnp.sqrt(fan_in))
        self.params = {
            "w_node": init(ks[0], dim_in_node, (dim_in_node, dim_inner)),
            "b_node": 0.5 * jax.random.normal(ks[1], (1, dim_inner), jnp.float32),
            "gamma_node": 1.0 + 0.1 * jax.random.normal(ks[2], (1, dim_inner), jnp.float32),
            "beta_node": 0.1 * jax.random.normal(ks[3], (1, dim_inner), jnp.float32),
            "w_edge": init(ks[4], dim_in_edge, (dim_in_edge, dim_inner)),
            "b_edge": 0.5 * jax.random.normal(ks[5], (1, dim_inner), jnp.float32),
            "gamma_edge": 1.0 + 0.1 * jax.random.normal(ks[6], (1, dim_inner), jnp.float32),
            "beta_edge": 0.1 * jax.random.normal(ks[7], (1, dim_inner), jnp.float32),
        }
        self.dim_in = dim_inner

    def __call__(self, batch):
        # Mirrors `for module in self.children(): batch = module(batch)`:
        # node_encoder -> node_encoder_bn -> edge_encoder -> edge_encoder_bn.
        x, edge_attr = _feature_encoder_forward(self.params, batch["x"], batch["edge_attr"])
        out = dict(batch)
        out["x"] = x
        out["edge_attr"] = edge_attr
        return out


# ---------------------------- reference & self-test ----------------------------

def _reference_one(x, w, b, gamma, beta):
    h = x @ w + b                                           # Linear (with bias)
    mean = h.mean(axis=0, keepdims=True)
    var = ((h - mean) ** 2).mean(axis=0, keepdims=True)     # biased var (PyTorch BN)
    return (h - mean) / jnp.sqrt(var + BN_EPS) * gamma + beta


def _reference(batch, p):
    return (_reference_one(batch["x"], p["w_node"], p["b_node"],
                           p["gamma_node"], p["beta_node"]),
            _reference_one(batch["edge_attr"], p["w_edge"], p["b_edge"],
                           p["gamma_edge"], p["beta_edge"]))


if __name__ == "__main__":
    key = jax.random.PRNGKey(0)
    k_x, k_e, k_p = jax.random.split(key, 3)

    num_nodes, num_edges = 16, 32
    dim_in_node, dim_in_edge, dim_inner = 4, 4, 32

    batch = {
        "x": jax.random.normal(k_x, (num_nodes, dim_in_node), jnp.float32),
        "edge_attr": jax.random.normal(k_e, (num_edges, dim_in_edge), jnp.float32),
        "edge_index": jnp.zeros((2, num_edges), jnp.int32),  # pass-through metadata
    }

    encoder = FeatureEncoderPallas(dim_in_node, dim_in_edge, dim_inner, k_p)
    out = encoder(batch)
    jax.block_until_ready(out["x"])
    jax.block_until_ready(out["edge_attr"])

    ref_x, ref_e = _reference(batch, encoder.params)
    assert out["x"].shape == ref_x.shape
    assert out["edge_attr"].shape == ref_e.shape
    assert jnp.allclose(out["x"], ref_x, atol=1e-4, rtol=1e-4), \
        float(jnp.max(jnp.abs(out["x"] - ref_x)))
    assert jnp.allclose(out["edge_attr"], ref_e, atol=1e-4, rtol=1e-4), \
        float(jnp.max(jnp.abs(out["edge_attr"] - ref_e)))

    print("KERNEL_OK")
</pallas_src>

<mosaic_0001>
module attributes {stable_mosaic.version = 11 : i64} {
  func.func @_linear_bn_apply_kernel(%arg0: i32, %arg1: memref<32x4xf32, #tpu.memory_space<vmem>>, %arg2: memref<4x32xf32, #tpu.memory_space<vmem>>, %arg3: memref<1x32xf32, #tpu.memory_space<vmem>>, %arg4: memref<32x32xf32, #tpu.memory_space<vmem>>) attributes {dimension_semantics = [#tpu.dimension_semantics<parallel>], iteration_bounds = array<i64: 1>, scalar_prefetch = 0 : i64, scratch_operands = 0 : i64, tpu.core_type = #tpu.core_type<tc>, window_params = [{transform_indices = @transform_0, window_bounds = array<i64: 32, 4>}, {pipeline_mode = #tpu.pipeline_mode<synchronous>, transform_indices = @transform_1, window_bounds = array<i64: 4, 32>}, {pipeline_mode = #tpu.pipeline_mode<synchronous>, transform_indices = @transform_2, window_bounds = array<i64: 1, 32>}, {transform_indices = @transform_3, window_bounds = array<i64: 32, 32>}]} {
    %c0 = arith.constant 0 : index
    %c0_0 = arith.constant 0 : index
    %0 = vector.load %arg1[%c0, %c0_0] : memref<32x4xf32, #tpu.memory_space<vmem>>, vector<32x4xf32>
    %c0_1 = arith.constant 0 : index
    %c0_2 = arith.constant 0 : index
    %1 = vector.load %arg2[%c0_1, %c0_2] : memref<4x32xf32, #tpu.memory_space<vmem>>, vector<4x32xf32>
    %cst = arith.constant dense<0.000000e+00> : vector<32x32xf32>
    %2 = tpu.matmul %0, %1, %cst {dimension_numbers = #tpu.dot_dimension_numbers<[1], [0], [0], [1], [0, 0, 1, 1], [], []>} : vector<32x4xf32>, vector<4x32xf32>, vector<32x32xf32> -> vector<32x32xf32>
    %c0_3 = arith.constant 0 : index
    %c0_4 = arith.constant 0 : index
    %3 = vector.load %arg3[%c0_3, %c0_4] : memref<1x32xf32, #tpu.memory_space<vmem>>, vector<1x32xf32>
    %4 = vector.broadcast %3 : vector<1x32xf32> to vector<32x32xf32>
    %5 = arith.addf %2, %4 : vector<32x32xf32>
    %c0_5 = arith.constant 0 : index
    %c0_6 = arith.constant 0 : index
    %6 = vector.load %arg4[%c0_5, %c0_6] : memref<32x32xf32, #tpu.memory_space<vmem>>, vector<32x32xf32>
    tpu.vector_store %arg4[%c0_5, %c0_6], %5 {strides = array<i32>} : memref<32x32xf32, #tpu.memory_space<vmem>>, vector<32x32xf32>,
    return
  }
  func.func @transform_0(%arg0: i32) -> (i32, i32) {
    %c0_i32 = arith.constant 0 : i32
    %c0_i32_0 = arith.constant 0 : i32
    return %arg0, %c0_i32 : i32, i32
  }
  func.func @transform_1(%arg0: i32) -> (i32, i32) {
    %c0_i32 = arith.constant 0 : i32
    %c0_i32_0 = arith.constant 0 : i32
    %c0_i32_1 = arith.constant 0 : i32
    return %c0_i32, %c0_i32_0 : i32, i32
  }
  func.func @transform_2(%arg0: i32) -> (i32, i32) {
    %c0_i32 = arith.constant 0 : i32
    %c0_i32_0 = arith.constant 0 : i32
    %c0_i32_1 = arith.constant 0 : i32
    return %c0_i32, %c0_i32_0 : i32, i32
  }
  func.func @transform_3(%arg0: i32) -> (i32, i32) {
    %c0_i32 = arith.constant 0 : i32
    %c0_i32_0 = arith.constant 0 : i32
    return %arg0, %c0_i32 : i32, i32
  }
}

module attributes {stable_mosaic.version = 11 : i64} {
  func.func @_linear_bn_apply_kernel(%arg0: i32, %arg1: memref<16x4xf32, #tpu.memory_space<vmem>>, %arg2: memref<4x32xf32, #tpu.memory_space<vmem>>, %arg3: memref<1x32xf32, #tpu.memory_space<vmem>>, %arg4: memref<16x32xf32, #tpu.memory_space<vmem>>) attributes {dimension_semantics = [#tpu.dimension_semantics<parallel>], iteration_bounds = array<i64: 1>, scalar_prefetch = 0 : i64, scratch_operands = 0 : i64, tpu.core_type = #tpu.core_type<tc>, window_params = [{transform_indices = @transform_0, window_bounds = array<i64: 16, 4>}, {pipeline_mode = #tpu.pipeline_mode<synchronous>, transform_indices = @transform_1, window_bounds = array<i64: 4, 32>}, {pipeline_mode = #tpu.pipeline_mode<synchronous>, transform_indices = @transform_2, window_bounds = array<i64: 1, 32>}, {transform_indices = @transform_3, window_bounds = array<i64: 16, 32>}]} {
    %c0 = arith.constant 0 : index
    %c0_0 = arith.constant 0 : index
    %0 = vector.load %arg1[%c0, %c0_0] : memref<16x4xf32, #tpu.memory_space<vmem>>, vector<16x4xf32>
    %c0_1 = arith.constant 0 : index
    %c0_2 = arith.constant 0 : index
    %1 = vector.load %arg2[%c0_1, %c0_2] : memref<4x32xf32, #tpu.memory_space<vmem>>, vector<4x32xf32>
    %cst = arith.constant dense<0.000000e+00> : vector<16x32xf32>
    %2 = tpu.matmul %0, %1, %cst {dimension_numbers = #tpu.dot_dimension_numbers<[1], [0], [0], [1], [0, 0, 1, 1], [], []>} : vector<16x4xf32>, vector<4x32xf32>, vector<16x32xf32> -> vector<16x32xf32>
    %c0_3 = arith.constant 0 : index
    %c0_4 = arith.constant 0 : index
    %3 = vector.load %arg3[%c0_3, %c0_4] : memref<1x32xf32, #tpu.memory_space<vmem>>, vector<1x32xf32>
    %4 = vector.broadcast %3 : vector<1x32xf32> to vector<16x32xf32>
    %5 = arith.addf %2, %4 : vector<16x32xf32>
    %c0_5 = arith.constant 0 : index
    %c0_6 = arith.constant 0 : index
    %6 = vector.load %arg4[%c0_5, %c0_6] : memref<16x32xf32, #tpu.memory_space<vmem>>, vector<16x32xf32>
    tpu.vector_store %arg4[%c0_5, %c0_6], %5 {strides = array<i32>} : memref<16x32xf32, #tpu.memory_space<vmem>>, vector<16x32xf32>,
    return
  }
  func.func @transform_0(%arg0: i32) -> (i32, i32) {
    %c0_i32 = arith.constant 0 : i32
    %c0_i32_0 = arith.constant 0 : i32
    return %arg0, %c0_i32 : i32, i32
  }
  func.func @transform_1(%arg0: i32) -> (i32, i32) {
    %c0_i32 = arith.constant 0 : i32
    %c0_i32_0 = arith.constant 0 : i32
    %c0_i32_1 = arith.constant 0 : i32
    return %c0_i32, %c0_i32_0 : i32, i32
  }
  func.func @transform_2(%arg0: i32) -> (i32, i32) {
    %c0_i32 = arith.constant 0 : i32
    %c0_i32_0 = arith.constant 0 : i32
    %c0_i32_1 = arith.constant 0 : i32
    return %c0_i32, %c0_i32_0 : i32, i32
  }
  func.func @transform_3(%arg0: i32) -> (i32, i32) {
    %c0_i32 = arith.constant 0 : i32
    %c0_i32_0 = arith.constant 0 : i32
    return %arg0, %c0_i32 : i32, i32
  }
}

</mosaic_0001>

<bundles_post_ra>
// kernel: _feature_encoder_forward.3
= control target key start
LH: loop header
LB: loop body
LE: loop exit
PB: predicated region body
PF: predicated region fallthrough
CT: control target
= control target key end

     0   :  { %vm40_vm0 = vcmask 1043456   ;;  %vm27_vm1 = vcmask 31744   ;;  %s251_s0 = inlined_call_operand.vmem [shape: f32[32,4], index: 0, kind: input, shape index: {}]   ;;  %s252_s1 = inlined_call_operand.vmem [shape: f32[4,32], index: 1, kind: input, shape index: {}]   ;;  %s253_s2 = inlined_call_operand.vmem [shape: f32[1,32], index: 2, kind: input, shape index: {}]   ;;  %s254_s3 = inlined_call_operand.hbm [shape: f32[32,32], index: 3, kind: output, shape index: {}]  }
   0x1   :  { %v19_v0 = vld [vmem:[%s252_s1] sm:$0xf]  ;;  %v17_v2 = vld [vmem:[%s251_s0 + $0x10] sm:$0xff]  ;;  %v16_v3 = vld [vmem:[%s251_s0 + $0x8] sm:$0xff] }
   0x2   :  { %v15_v1 = vld [vmem:[%s251_s0] sm:$0xff]  ;;  %161 = vmatprep.subr.msk.mxu0 %vm40_vm0, %v19_v0  ;;  %169 = vmatprep.subr.msk.mxu1 %vm40_vm0, %v19_v0  ;;  %v18_v4 = vld [vmem:[%s251_s0 + $0x18] sm:$0xff] }
   0x3   :  { %8 = vsyncpa [#allocation3], 0  ;;  %162 = vmatpush3.msk.msra.mxu0 %vm40_vm0, %v19_v0  ;;  %170 = vmatpush3.msk.msra.mxu1 %vm40_vm0, %v19_v0  ;;  %v150_v5 = vld [vmem:[%s253_s2] ss:$0 sm:$0xff]  ;;  %s198_s23 = smov [#allocation2]   ;;  %vm129_vm2 = vcmask 261120  }
   0x4   :  { %163 = vmatprep.mubr.msk.f32.mxu0 %vm27_vm1, %v15_v1  ;;  %166 = vmatprep.mubr.msk.f32.mxu1 %vm27_vm1, %v17_v2  ;;  %s139_s24 = sshll.u32 %s198_s23, 4  ;;  %s140_s24 = int_to_ptr.vmem [resolvable:$true] %s139_s24 }
   0x5   :  { %164 = vmatmul.mubr.msk.f32.vlgmr.msra.gmra.mrb[0].mxu0 %vm27_vm1, %v16_v3  ;;  %167 = vmatmul.mubr.msk.f32.vlgmr.msra.gmra.mrb[0].mxu1 %vm27_vm1, %v18_v4  ;;  %s174_s0 = scalar_lea.vmem %s140_s24, 512  ;;  %p179_p1 = scmp.lt.s32.totalorder %s140_s24, %s140_s24 }
   0x6   :  { %p175_p0 = scmp.ne.s32.totalorder %s140_s24, %s174_s0  ;;  %p180_p2 = scmp.lt.s32.totalorder %s174_s0, %s174_s0 }
   0x8   :  { %p181_p3 = por %p180_p2, %p179_p1 }
   0xa   :  { %p182_p4 = pnand %p181_p3, %p175_p0 }
  0xd8   :  { %v165_v6 = vpop.f32.mrb[0].mxu0  ;;  %v168_v7 = vpop.f32.mrb[0].mxu1 }
  0xd9   :  { %v116_v8 = vadd.f32 %v165_v6, %v150_v5  ;;  %v126_v9 = vadd.f32 %v168_v7, %v150_v5  ;;  %v110_v10 = vpop.f32.mrb[1].mxu0  ;;  %v120_v11 = vpop.f32.mrb[1].mxu1 }
  0xda   :  { %v111_v12 = vadd.f32 %v150_v5, %v110_v10  ;;  %v121_v13 = vadd.f32 %v150_v5, %v120_v11 }
  0xdb   :  { %131 = vst.msk [vmem:[#allocation2 + $0x8] sm:$0xff] %vm129_vm2, %v116_v8  ;;  %133 = vst.msk [vmem:[#allocation2 + $0x18] sm:$0xff] %vm129_vm2, %v126_v9 }
  0xdc   :  { %130 = vst.msk [vmem:[#allocation2] sm:$0xff] %vm129_vm2, %v111_v12  ;;  %132 = vst.msk [vmem:[#allocation2 + $0x10] sm:$0xff] %vm129_vm2, %v121_v13 }
  0xdd   :  { %185 = shalt.err (!%p182_p4)
}
  0xde   :  { %s186_s26 = scalar_lea.hbm %s254_s3, 512 }
  0xdf   :  { %p187_p5 = scmp.ne.s32.totalorder %s254_s3, %s186_s26  ;;  %p190_p6 = scmp.lt.u32.totalorder %s186_s26, %s254_s3 }
  0xe1   :  { %p192_p7 = pnand %p190_p6, %p187_p5 }
  0xe3   :  { %195 = shalt.err (!%p192_p7)
}
  0xe4   :  { %s199_s4 = smov 128   ;;  %s200_s5 = smov 8  }
  0xe5   :  { %145 = dma.vmem_to_hbm [thread:$0]  %s140_s24, 512, %s254_s3, [#allocation3], %s199_s4, %s199_s4, %s200_s5  }
  0xe6   :  { %196 = dma.done.wait [#allocation3], 512  }
  0xe7   :  { %197 = vsyncadd [#allocation3], 4294966784 }
  0xe8   :  { %149 = vsyncpa [#allocation3], 1 }

// kernel: _feature_encoder_forward.2
= control target key start
LH: loop header
LB: loop body
LE: loop exit
PB: predicated region body
PF: predicated region fallthrough
CT: control target
= control target key end

     0   :  { %vm32_vm0 = vcmask 1043456   ;;  %vm25_vm1 = vcmask 31744   ;;  %s216_s0 = inlined_call_operand.vmem [shape: f32[16,4], index: 0, kind: input, shape index: {}]   ;;  %s217_s1 = inlined_call_operand.vmem [shape: f32[4,32], index: 1, kind: input, shape index: {}]   ;;  %s218_s2 = inlined_call_operand.vmem [shape: f32[1,32], index: 2, kind: input, shape index: {}]   ;;  %s219_s3 = inlined_call_operand.hbm [shape: f32[16,32], index: 3, kind: output, shape index: {}]  }
   0x1   :  { %v17_v0 = vld [vmem:[%s217_s1] sm:$0xf]  ;;  %v16_v2 = vld [vmem:[%s216_s0 + $0x8] sm:$0xff] }
   0x2   :  { %v15_v1 = vld [vmem:[%s216_s0] sm:$0xff]  ;;  %137 = vmatprep.subr.msk.mxu0 %vm32_vm0, %v17_v0 }
   0x3   :  { %139 = vmatprep.mubr.msk.f32.mxu0 %vm25_vm1, %v15_v1 }
   0x4   :  { %8 = vsyncpa [#allocation3], 0  ;;  %138 = vmatpush3.msk.msra.mxu0 %vm32_vm0, %v17_v0  ;;  %v130_v3 = vld [vmem:[%s218_s2] ss:$0 sm:$0xff]  ;;  %s169_s1 = smov [#allocation2]   ;;  %vm111_vm2 = vcmask 261120  }
   0x5   :  { %140 = vmatmul.mubr.msk.f32.vlgmr.msra.gmra.mrb[0].mxu0 %vm25_vm1, %v16_v2  ;;  %s119_s20 = sshll.u32 %s169_s1, 4  ;;  %s120_s20 = int_to_ptr.vmem [resolvable:$true] %s119_s20 }
   0x6   :  { %s145_s0 = scalar_lea.vmem %s120_s20, 256  ;;  %p150_p1 = scmp.lt.s32.totalorder %s120_s20, %s120_s20 }
   0x7   :  { %p146_p0 = scmp.ne.s32.totalorder %s120_s20, %s145_s0  ;;  %p151_p2 = scmp.lt.s32.totalorder %s145_s0, %s145_s0 }
   0x9   :  { %p152_p3 = por %p151_p2, %p150_p1 }
   0xb   :  { %p153_p4 = pnand %p152_p3, %p146_p0 }
  0xd8   :  { %v141_v4 = vpop.f32.mrb[0].mxu0 }
  0xd9   :  { %v108_v5 = vadd.f32 %v141_v4, %v130_v3  ;;  %v102_v6 = vpop.f32.mrb[1].mxu0 }
  0xda   :  { %v103_v7 = vadd.f32 %v130_v3, %v102_v6 }
  0xdb   :  { %113 = vst.msk [vmem:[#allocation2 + $0x8] sm:$0xff] %vm111_vm2, %v108_v5 }
  0xdc   :  { %112 = vst.msk [vmem:[#allocation2] sm:$0xff] %vm111_vm2, %v103_v7 }
  0xdd   :  { %156 = shalt.err (!%p153_p4)
}
  0xde   :  { %s157_s2 = scalar_lea.hbm %s219_s3, 256 }
  0xdf   :  { %p158_p5 = scmp.ne.s32.totalorder %s219_s3, %s157_s2  ;;  %p161_p6 = scmp.lt.u32.totalorder %s157_s2, %s219_s3 }
  0xe1   :  { %p163_p7 = pnand %p161_p6, %p158_p5 }
  0xe3   :  { %166 = shalt.err (!%p163_p7)
}
  0xe4   :  { %s170_s27 = smov 128   ;;  %s171_s28 = smov 8  }
  0xe5   :  { %125 = dma.vmem_to_hbm [thread:$0]  %s120_s20, 256, %s219_s3, [#allocation3], %s170_s27, %s170_s27, %s171_s28  }
  0xe6   :  { %167 = dma.done.wait [#allocation3], 256  }
  0xe7   :  { %168 = vsyncadd [#allocation3], 4294967040 }
  0xe8   :  { %129 = vsyncpa [#allocation3], 1 }

</bundles_post_ra>
